<compile_context>
chip_gen: v6e
topology: v6e:2x2x1
jax: 0.10.0
libtpu: 0.0.40
codegen_flags: <defaults>
</compile_context>

<pallas_src>
import functools

import jax
import jax.numpy as jnp
from jax.experimental import pallas as pl
from jax.experimental.pallas import tpu as pltpu


def _focal_loss_kernel(x_ref, t_ref, *rest, gamma, has_alpha, hw):
    if has_alpha:
        a_ref, o_ref = rest
    else:
        (o_ref,) = rest

    j = pl.program_id(1)                                   # H*W tile index

    x = x_ref[0].astype(jnp.float32)                       # (C, TH)  logits
    t = t_ref[0]                                           # (1, TH)  int32 targets
    C, TH = x.shape

    # log_softmax over the class (sublane) axis, numerically stable.
    m = jnp.max(x, axis=0, keepdims=True)                  # (1, TH)
    shifted = x - m                                        # (C, TH)
    lse = jnp.log(jnp.sum(jnp.exp(shifted), axis=0, keepdims=True))  # (1, TH)

    # gather the target-class logit via one-hot select + sublane reduce.
    cls = jax.lax.broadcasted_iota(jnp.int32, (C, TH), 0)  # (C, TH)
    onehot = (cls == t).astype(jnp.float32)                # (C, TH)
    s_t = jnp.sum(onehot * shifted, axis=0, keepdims=True)  # (1, TH) = shifted[target]
    logpt = s_t - lse                                       # (1, TH) = log p_t

    if has_alpha:
        a = a_ref[0].astype(jnp.float32)                   # (C, 1)
        at = jnp.sum(onehot * a, axis=0, keepdims=True)    # (1, TH) = alpha[target]
        logpt_w = logpt * at
    else:
        logpt_w = logpt

    g = float(gamma)
    if g == 0.0:
        # (1 - p_t)**0 == 1 exactly in the reference; skip the exp entirely.
        loss = -logpt_w
    else:
        pt = jnp.exp(logpt)
        omp = 1.0 - pt
        w = jax.lax.integer_pow(omp, int(g)) if g.is_integer() else omp ** g
        loss = -w * logpt_w                                # (1, TH)

    # Mask the padded tail (only emitted when H*W is not a multiple of the tile).
    if hw % TH != 0:
        col = jax.lax.broadcasted_iota(jnp.int32, (1, TH), 1) + j * TH
        loss = jnp.where(col < hw, loss, 0.0)

    # Per-block partial sum, written as a full-width (unmasked) 128-lane store.
    partial = jnp.sum(loss)
    lane = jax.lax.broadcasted_iota(jnp.int32, (1, 1, 128), 2)
    o_ref[...] = jnp.where(lane == 0, partial, 0.0).astype(jnp.float32)


def focal_loss(x_nchw, target_nhw, gamma=0.0, alpha=None, tile_hw=None):
    """FocalLoss forward. x_nchw: (N, C, H, W) float, target_nhw: (N, H, W) int."""
    N, C, H, W = x_nchw.shape
    HW = H * W
    rows = N * HW

    # Free reshapes only — no transpose, no extra HBM pass.
    x3 = x_nchw.reshape(N, C, HW)
    t3 = target_nhw.reshape(N, 1, HW).astype(jnp.int32)

    if tile_hw is None:
        hw_pad = pl.cdiv(HW, 128) * 128
        # ~2 MiB of logits per block (amortizes per-step overhead, fits v7x VMEM
        # comfortably with double-buffering even for larger C).
        budget = max(128, ((2 * 1024 * 1024) // (4 * C)) // 128 * 128)
        tile_hw = min(hw_pad, budget)
    assert tile_hw % 128 == 0, "tile_hw must be a multiple of 128 lanes"
    num_tiles = pl.cdiv(HW, tile_hw)

    has_alpha = alpha is not None
    args = [x3, t3]
    in_specs = [
        pl.BlockSpec((1, C, tile_hw), lambda n, j: (n, 0, j)),   # logits tile
        pl.BlockSpec((1, 1, tile_hw), lambda n, j: (n, 0, j)),   # target tile
    ]
    if has_alpha:
        a3 = jnp.asarray(alpha, dtype=jnp.float32).reshape(1, C, 1)
        args.append(a3)
        in_specs.append(pl.BlockSpec((1, C, 1), lambda n, j: (0, 0, 0)))  # resident

    kernel = functools.partial(
        _focal_loss_kernel, gamma=float(gamma), has_alpha=has_alpha, hw=HW)

    cost = pl.CostEstimate(
        flops=int(rows * C * 8),
        transcendentals=int(rows * (C + 2)),
        bytes_accessed=int(x3.size * x3.dtype.itemsize
                           + t3.size * 4
                           + N * num_tiles * 128 * 4),
    )

    partials = pl.pallas_call(
        kernel,
        out_shape=jax.ShapeDtypeStruct((N, 1, num_tiles * 128), jnp.float32),
        grid=(N, num_tiles),
        in_specs=in_specs,
        out_specs=pl.BlockSpec((1, 1, 128), lambda n, j: (n, 0, j)),
        compiler_params=pltpu.CompilerParams(
            dimension_semantics=("parallel", "parallel")),
        cost_estimate=cost,
    )(*args)

    # size_average=True -> mean over all rows; tiny reduction done in plain JAX.
    return jnp.sum(partials) / jnp.float32(rows)


def _reference(x_nchw, target_nhw, gamma=0.0, alpha=None):
    N, C, H, W = x_nchw.shape
    x2d = jnp.transpose(x_nchw.reshape(N, C, H * W), (0, 2, 1)).reshape(-1, C)
    t = target_nhw.reshape(-1).astype(jnp.int32)
    logp = jax.nn.log_softmax(x2d.astype(jnp.float32), axis=1)
    logpt = jnp.take_along_axis(logp, t[:, None], axis=1)[:, 0]
    pt = jnp.exp(logpt)
    if alpha is not None:
        logpt = logpt * jnp.asarray(alpha, dtype=jnp.float32)[t]
    loss = -logpt if float(gamma) == 0.0 else -((1.0 - pt) ** float(gamma)) * logpt
    return jnp.mean(loss)


if __name__ == "__main__":
    key = jax.random.PRNGKey(0)
    k1, k2, k3, k4 = jax.random.split(key, 4)

    # Module defaults: class_num=2, gamma=0, alpha=None, size_average=True.
    N, C, H, W = 2, 2, 16, 16
    x = jax.random.normal(k1, (N, C, H, W), dtype=jnp.float32)
    tgt = jax.random.randint(k2, (N, H, W), 0, C, dtype=jnp.int32)

    out = jax.block_until_ready(focal_loss(x, tgt, gamma=0.0, alpha=None))
    ref = _reference(x, tgt, gamma=0.0, alpha=None)
    assert jnp.allclose(out, ref, atol=1e-5, rtol=1e-5), (out, ref)

    # Also exercise gamma>0 + alpha and a spatial size that is not a multiple of 128
    # (tail-mask path).
    N2, C2, H2, W2 = 2, 4, 10, 10
    x2 = jax.random.normal(k3, (N2, C2, H2, W2), dtype=jnp.float32)
    t2 = jax.random.randint(k4, (N2, H2, W2), 0, C2, dtype=jnp.int32)
    alpha2 = jnp.array([0.1, 0.2, 0.3, 0.4], dtype=jnp.float32)
    out2 = jax.block_until_ready(focal_loss(x2, t2, gamma=2.0, alpha=alpha2))
    ref2 = _reference(x2, t2, gamma=2.0, alpha=alpha2)
    assert jnp.allclose(out2, ref2, atol=1e-5, rtol=1e-5), (out2, ref2)

    print("KERNEL_OK")
</pallas_src>

<mosaic_0001>
module attributes {stable_mosaic.version = 11 : i64} {
  func.func @_focal_loss_kernel(%arg0: i32, %arg1: i32, %arg2: memref<1x2x256xf32, #tpu.memory_space<vmem>>, %arg3: memref<1x1x256xi32, #tpu.memory_space<vmem>>, %arg4: memref<1x1x128xf32, #tpu.memory_space<vmem>>) attributes {dimension_semantics = [#tpu.dimension_semantics<parallel>, #tpu.dimension_semantics<parallel>], iteration_bounds = array<i64: 2, 1>, scalar_prefetch = 0 : i64, scratch_operands = 0 : i64, tpu.core_type = #tpu.core_type<tc>, window_params = [{transform_indices = @transform_0, window_bounds = array<i64: 1, 2, 256>}, {transform_indices = @transform_1, window_bounds = array<i64: 1, 1, 256>}, {transform_indices = @transform_2, window_bounds = array<i64: 1, 1, 128>}]} {
    %c0 = arith.constant 0 : index
    %c0_0 = arith.constant 0 : index
    %c0_1 = arith.constant 0 : index
    %0 = vector.load %arg2[%c0, %c0_0, %c0_1] : memref<1x2x256xf32, #tpu.memory_space<vmem>>, vector<1x2x256xf32>
    %1 = vector.shape_cast %0 : vector<1x2x256xf32> to vector<2x256xf32>
    %c0_2 = arith.constant 0 : index
    %c0_3 = arith.constant 0 : index
    %c0_4 = arith.constant 0 : index
    %2 = vector.load %arg3[%c0_2, %c0_3, %c0_4] : memref<1x1x256xi32, #tpu.memory_space<vmem>>, vector<1x1x256xi32>
    %3 = vector.shape_cast %2 : vector<1x1x256xi32> to vector<1x256xi32>
    %cst = arith.constant dense<0xFF800000> : vector<256xf32>
    %4 = vector.multi_reduction <maximumf>, %1, %cst [0] : vector<2x256xf32> to vector<256xf32>
    %5 = vector.shape_cast %4 : vector<256xf32> to vector<1x256xf32>
    %6 = vector.broadcast %5 : vector<1x256xf32> to vector<2x256xf32>
    %7 = arith.subf %1, %6 : vector<2x256xf32>
    %8 = math.exp %7 : vector<2x256xf32>
    %cst_5 = arith.constant dense<0.000000e+00> : vector<256xf32>
    %9 = vector.multi_reduction <add>, %8, %cst_5 [0] : vector<2x256xf32> to vector<256xf32>
    %10 = vector.shape_cast %9 : vector<256xf32> to vector<1x256xf32>
    %11 = math.log %10 : vector<1x256xf32>
    %12 = tpu.iota {dimensions = array<i32: 0>} : vector<2x256xi32>
    %13 = vector.broadcast %3 : vector<1x256xi32> to vector<2x256xi32>
    %14 = arith.cmpi eq, %12, %13 : vector<2x256xi32>
    %15 = arith.extui %14 : vector<2x256xi1> to vector<2x256xi32>
    %16 = arith.sitofp %15 : vector<2x256xi32> to vector<2x256xf32>
    %17 = arith.mulf %16, %7 : vector<2x256xf32>
    %cst_6 = arith.constant dense<0.000000e+00> : vector<256xf32>
    %18 = vector.multi_reduction <add>, %17, %cst_6 [0] : vector<2x256xf32> to vector<256xf32>
    %19 = vector.shape_cast %18 : vector<256xf32> to vector<1x256xf32>
    %20 = arith.subf %19, %11 : vector<1x256xf32>
    %cst_7 = arith.constant 0.000000e+00 : f32
    %21 = vector.broadcast %cst_7 : f32 to vector<1x256xf32>
    %22 = arith.subf %21, %20 : vector<1x256xf32>
    %23 = vector.shape_cast %22 : vector<1x256xf32> to vector<1x1x256xf32>
    %cst_8 = arith.constant dense<0.000000e+00> : vector<1xf32>
    %24 = vector.multi_reduction <add>, %23, %cst_8 [1, 2] : vector<1x1x256xf32> to vector<1xf32>
    %25 = vector.shape_cast %24 : vector<1xf32> to vector<1x1x1xf32>
    %26 = vector.extract %25[0, 0, 0] : f32 from vector<1x1x1xf32>
    %27 = tpu.iota {dimensions = array<i32: 2>} : vector<1x1x128xi32>
    %c0_i32 = arith.constant 0 : i32
    %28 = vector.broadcast %c0_i32 : i32 to vector<1x1x128xi32>
    %29 = arith.cmpi eq, %27, %28 : vector<1x1x128xi32>
    %cst_9 = arith.constant 0.000000e+00 : f32
    %30 = vector.broadcast %26 : f32 to vector<1x1x128xf32>
    %31 = vector.broadcast %cst_9 : f32 to vector<1x1x128xf32>
    %32 = arith.select %29, %30, %31 : vector<1x1x128xi1>, vector<1x1x128xf32>
    %c0_10 = arith.constant 0 : index
    %c0_11 = arith.constant 0 : index
    %c0_12 = arith.constant 0 : index
    %33 = vector.load %arg4[%c0_10, %c0_11, %c0_12] : memref<1x1x128xf32, #tpu.memory_space<vmem>>, vector<1x1x128xf32>
    tpu.vector_store %arg4[%c0_10, %c0_11, %c0_12], %32 {strides = array<i32>} : memref<1x1x128xf32, #tpu.memory_space<vmem>>, vector<1x1x128xf32>,
    return
  }
  func.func @transform_0(%arg0: i32, %arg1: i32) -> (i32, i32, i32) {
    %c0_i32 = arith.constant 0 : i32
    %c0_i32_0 = arith.constant 0 : i32
    return %arg0, %c0_i32, %arg1 : i32, i32, i32
  }
  func.func @transform_1(%arg0: i32, %arg1: i32) -> (i32, i32, i32) {
    %c0_i32 = arith.constant 0 : i32
    %c0_i32_0 = arith.constant 0 : i32
    return %arg0, %c0_i32, %arg1 : i32, i32, i32
  }
  func.func @transform_2(%arg0: i32, %arg1: i32) -> (i32, i32, i32) {
    %c0_i32 = arith.constant 0 : i32
    %c0_i32_0 = arith.constant 0 : i32
    return %arg0, %c0_i32, %arg1 : i32, i32, i32
  }
}

</mosaic_0001>

<bundles_post_ra>
// kernel: tpu_custom_call.1
= control target key start
LH: loop header
LB: loop body
LE: loop exit
PB: predicated region body
PF: predicated region fallthrough
CT: control target
= control target key end

     0   :  { %7 = vsyncpa [#allocation3], 0  ;;  %s917_s0 = inlined_call_operand.hbm [shape: f32[2,2,256], index: 0, kind: input, shape index: {}]   ;;  %s918_s1 = inlined_call_operand.hbm [shape: s32[2,1,256], index: 1, kind: input, shape index: {}]   ;;  %s919_s2 = inlined_call_operand.hbm [shape: f32[2,1,128], index: 2, kind: output, shape index: {}]  }
   0x1   :  { %9 = vsyncpa [#allocation3 + $0x1], 0 }
   0x2   :  { %10 = vsyncpa [#allocation6], 0 }
   0x3   :  { %12 = vsyncpa [#allocation6 + $0x1], 0 }
   0x4   :  { %13 = vsyncpa [#allocation4], 0 }
   0x5   :  { %15 = vsyncpa [#allocation4 + $0x1], 0  ;;  %s735_s9 = smov 0   ;;  %s737_s10 = smov 0  }
   0x6   :  { %s739_s11 = smov 0   ;;  %s741_s12 = smov 0  }
   0x7   :  { %s743_s13 = smov 0   ;;  %s745_s14 = smov 0  }
   0x8 LB: > { %s476_s15 = sadd.s32 4294967295, %s713_s14   ;;  %s477_s16 = sadd.s32 4294967294, %s713_s14   ;;  %s713_s14 = sphi %s745_s14, %s21_s14   ;;  %s709_s13 = sphi %s743_s13, %s931_s13   ;;  %s705_s12 = sphi %s741_s12, %s930_s12   ;;  %s701_s11 = sphi %s739_s11, %s929_s11   ;;  %s697_s10 = sphi %s737_s10, %s928_s10   ;;  %s693_s9 = sphi %s735_s9, %s927_s9  }
   0x9   : > { %s33_s17 = sadd.s32 1, %s709_s13  ;;  %s42_s18 = sadd.s32 1, %s701_s11 }
   0xa   : > { %p35_p0 = scmp.ge.s32.totalorder %s33_s17, 2  ;;  %p49_p1 = scmp.ne.s32.totalorder %s701_s11, %s697_s10 }
   0xb   : > { %p50_p2 = scmp.eq.s32.totalorder %s713_s14, 0  ;;  %p55_p3 = scmp.ne.s32.totalorder %s697_s10, %s693_s9 }
   0xc   : > { %s933_s17 = smov (%p35_p0, %s33_s17), 0  ;;  %p56_p5 = scmp.eq.s32.totalorder %s476_s15, 0 }
   0xd   : > { %p776_p4 = por %p50_p2, %p49_p1  ;;  %s37_s20 = ssub.s32 %s709_s13, %s933_s17 }
   0xe   : > { %p109_p6 = scmp.eq.s32.totalorder %s476_s15, 1  ;;  %p40_p7 = scmp.eq.s32.totalorder %s37_s20, 0 }
   0xf   : > { %p782_p8 = por %p56_p5, %p55_p3  ;;  %p115_p10 = scmp.eq.s32.totalorder %s477_s16, 1 }
  0x10   : > { %p786_p9 = por %p109_p6, %p49_p1  ;;  %p515_p13 = scmp.lt.s32.totalorder %s713_s14, 2 }
  0x11   : > { %s791_s23 = scalar_select %p40_p7, %s701_s11, %s42_s18  }
  0x12   : > { %p793_p11 = por %p115_p10, %p55_p3  ;;  %s800_s25 = sand.u32 1, %s701_s11  }
  0x13   : > { %s480_s26 = sshll.u32 %s800_s25, 2  ;;  %s494_s27 = sshll.u32 %s709_s13, 6 }
  0x14   : > { %s147_s30 = scalar_lea.hbm %s917_s0, %s494_s27  ;;  %s139_s3 = scalar_lea.vmem [#allocation2], %s480_s26 }
  0x15   : > { %s149_s4 = sshll.u32 %s139_s3, 4  ;;  %p809_p0 = pnand %p515_p13, %p776_p4  ;;  %s150_s4 = int_to_ptr.vmem [resolvable:$true] %s149_s4 }
  0x16   : > { %p486_p1 = scmp.ge.s32.totalorder %s713_s14, 1  ;;  %p175_p2 = scmp.lt.s32.totalorder %s713_s14, 3 }
  0x17   : > { %s136_s6 = scalar_lea.sflag [#allocation3], %s800_s25  ;;  %p575_p3 = pneg %p809_p0 }
  0x18   : > { %s586_s7 = scalar_lea.vmem %s150_s4, 64  ;;  %s715_s8 = smov [#allocation2]  }
  0x19   : > { %p587_p5 = scmp.ne.s32.totalorder %s150_s4, %s586_s7  ;;  %s591_s15 = sshll.u32 %s715_s8, 4  ;;  %s592_s15 = int_to_ptr.vmem [resolvable:$false] %s591_s15 }
  0x1a   : > { %s593_s16 = scalar_lea.vmem %s592_s15, 128  ;;  %p594_p4 = scmp.lt.s32.totalorder %s150_s4, %s592_s15 }
  0x1b   : > { %p589_p6 = pnand %p587_p5, %p575_p3  ;;  %p595_p10 = scmp.lt.s32.totalorder %s593_s16, %s586_s7 }
  0x1d   : > { %p590_p7 = pneg %p589_p6  ;;  %p596_p13 = por %p595_p10, %p594_p4 }
  0x1f   : > { %p597_p12 = pnand %p596_p13, %p590_p7 }
  0x21   : > { %600 = shalt.err (!%p597_p12)
}
  0x22   : > { %507 = dma.hbm_to_vmem [thread:$0]  (!%p809_p0), %s147_s30, 64, %s150_s4, %s136_s6  }
  0x23   : > { %p827_p5 = pnand %p486_p1, %p175_p2  ;;  %s483_s19 = sshll.u32 %s800_s25, 1 }
  0x24   : > { %s495_s20 = sshll.u32 %s709_s13, 5  ;;  %s160_s29 = scalar_lea.vmem [#allocation5], %s483_s19 }
  0x25   : > { %s168_s28 = scalar_lea.hbm %s918_s1, %s495_s20  ;;  %s170_s3 = sshll.u32 %s160_s29, 4  ;;  %s171_s3 = int_to_ptr.vmem [resolvable:$true] %s170_s3 }
  0x26   : > { %s157_s7 = scalar_lea.sflag [#allocation6], %s800_s25  ;;  %s614_s8 = scalar_lea.vmem %s171_s3, 32 }
  0x27   : > { %p615_p12 = scmp.ne.s32.totalorder %s171_s3, %s614_s8  ;;  %s716_s30 = smov [#allocation5]  }
  0x28   : > { %s619_s4 = sshll.u32 %s716_s30, 4  ;;  %s620_s4 = int_to_ptr.vmem [resolvable:$false] %s619_s4 }
  0x29   : > { %p617_p6 = pnand %p615_p12, %p575_p3  ;;  %s621_s6 = scalar_lea.vmem %s620_s4, 64 }
  0x2a   : > { %p622_p1 = scmp.lt.s32.totalorder %s171_s3, %s620_s4  ;;  %p623_p2 = scmp.lt.s32.totalorder %s621_s6, %s614_s8 }
  0x2b   : > { %p618_p7 = pneg %p617_p6 }
  0x2c   : > { %p624_p4 = por %p623_p2, %p622_p1 }
  0x2e   : > { %p625_p10 = pnand %p624_p4, %p618_p7 }
  0x30   : > { %628 = shalt.err (!%p625_p10)
}
  0x31   : > { %510 = dma.hbm_to_vmem [thread:$0]  (!%p809_p0), %s168_s28, 32, %s171_s3, %s157_s7  }
  0x32   : > { %179 = sbr.rel (%p827_p5) target bundleno = 360 (0x168), region = 28  ;;  %s845_s25 = sand.u32 (!%p827_p5), 1, %s697_s10  }
  0x33   : > { %s487_s15 = sshll.u32 (!%p827_p5), %s845_s25, 2  ;;  %s182_s16 = scalar_lea.sflag (!%p827_p5), [#allocation3], %s845_s25 }
  0x34   : > { %s185_s19 = scalar_lea.vmem (!%p827_p5), [#allocation2], %s487_s15 }
  0x37   : > { %680 = dma.done.wait (%p782_p8), %s182_s16, 64  }
  0x38   : > { %682 = vsyncadd (%p782_p8), %s182_s16, 4294967232  ;;  %s488_s5 = sshll.u32 %s845_s25, 1  ;;  %s191_s18 = scalar_lea.sflag [#allocation6], %s845_s25 }
  0x39   : > { %s855_s20 = scalar_lea.vmem [#allocation5], %s488_s5 }
  0x3a   : > { %684 = dma.done.wait (%p782_p8), %s191_s18, 32  }
  0x3b   : > { %686 = vsyncadd (%p782_p8), %s191_s18, 4294967264  ;;  %v227_v0 = vlaneseq  ;;  %v717_v1 = vmov 1983009808   ;;  %v221_v6 = vld [vmem:[%s185_s19] sm:$0xf]  ;;  %vm234_vm0 = vcmask 1041408  }
  0x3c   : > { %v225_v2 = vunpack.c.l.s4 %v717_v1  ;;  %v222_v28 = vld [vmem:[%s855_s20] sm:$0x3]  ;;  %v718_v33 = vmov 0.0   ;;  %vm339_vm3 = vcmask 1040384   ;;  %s491_s21 = sshll.u32 %s705_s12, 4  ;;  %s218_s26 = scalar_lea.vmem [#allocation7], %s845_s25 }
  0x3d   : > { %v228_v3 = vshrl.u32 %v227_v0, 7  ;;  %s372_s27 = sshll.u32 %s218_s26, 4  ;;  %s875_s7 = scalar_lea.hbm %s919_s2, %s491_s21  ;;  %s373_s27 = int_to_ptr.vmem [resolvable:$true] %s372_s27 }
  0x3e   : > { %v226_v4 = vunpack.c.0.s8 %v225_v2  ;;  %s359_s8 = scalar_lea.sflag [#allocation4], %s845_s25  ;;  %s629_s30 = scalar_lea.vmem %s373_s27, 16 }
  0x3f   : > { %v296_v27 = vsub.s32 0, %v228_v3  ;;  %v300_v29 = vsub.s32 1, %v228_v3  ;;  %p630_p8 = scmp.ne.s32.totalorder %s373_s27, %s629_s30  ;;  %s719_s12 = smov [#allocation7]  }
  0x40   : > { %v229_v5 = vsub.s32 %v226_v4, %v228_v3  ;;  %s633_s4 = sshll.u32 %s719_s12, 4  ;;  %s634_s4 = int_to_ptr.vmem [resolvable:$false] %s633_s4 }
  0x41   : > { %v297_v30 = vrot.slane %v222_v28, %v296_v27  ;;  %v301_v31 = vrot.slane %v222_v28, %v300_v29  ;;  %p631_p0 = pnand %p630_p8, %p786_p9  ;;  %s635_s6 = scalar_lea.vmem %s634_s4, 32 }
  0x42   : > { %v230_v7 = vrot.slane %v221_v6, %v229_v5  ;;  %p636_p13 = scmp.lt.s32.totalorder %s373_s27, %s634_s4  ;;  %p637_p5 = scmp.lt.s32.totalorder %s635_s6, %s629_s30 }
  0x43   : > { %vm302_vm1 = vcmp.eq.s32.totalorder %v228_v3, %v297_v30  ;;  %vm303_vm2 = vcmp.eq.s32.totalorder %v228_v3, %v301_v31  ;;  %p632_p3 = pneg %p631_p0 }
  0x44   : > { %v231_v8 = vcombine.high %v230_v7, %v230_v7  ;;  %v235_v9 = vsel %vm234_vm0, %v230_v7, -inf  ;;  %v489_v34 = vsel %vm302_vm1, 1.0, %v718_v33  ;;  %v490_v37 = vsel %vm303_vm2, 1.0, %v718_v33  ;;  %p638_p12 = por %p637_p5, %p636_p13 }
  0x45   : > { %v236_v10 = vrot.slane %v235_v9, 4 }
  0x46   : > { %v242_v11 = vsel %vm234_vm0, %v231_v8, -inf  ;;  %p639_p6 = pnand %p638_p12, %p632_p3 }
  0x47   : > { %v237_v12 = vmax.f32 %v235_v9, %v236_v10  ;;  %v243_v13 = vrot.slane %v242_v11, 4 }
  0x49   : > { %v238_v14 = vrot.slane %v237_v12, 2  ;;  %v244_v15 = vmax.f32 %v242_v11, %v243_v13 }
  0x4b   : > { %v239_v16 = vmax.f32 %v237_v12, %v238_v14  ;;  %v245_v17 = vrot.slane %v244_v15, 2 }
  0x4d   : > { %v240_v18 = vrot.slane %v239_v16, 1  ;;  %v246_v19 = vmax.f32 %v244_v15, %v245_v17 }
  0x4f   : > { %v241_v20 = vmax.f32 %v239_v16, %v240_v18  ;;  %v247_v21 = vrot.slane %v246_v19, 1 }
  0x51   : > { %v248_v22 = vmax.f32 %v246_v19, %v247_v21 }
  0x53   : > { %v251_v23 = vcombine.low %v241_v20, %v248_v22 }
  0x55   : > { %v258_v24 = vrot.slane %v251_v23, %v229_v5 }
  0x57   : > { %v260_v25 = vsub.f32 %v221_v6, %v258_v24 }
  0x59   : > { %v261_v26 = vmul.f32 1.442695, %v260_v25  ;;  %v315_v32 = vrot.slane %v260_v25, %v229_v5  ;;  %v353_v25 = vand.u32 127, %v227_v0 }
  0x5b   : > { %567 = vpow2.f32 %v261_v26  ;;  %v316_v35 = vcombine.high %v315_v32, %v315_v32  ;;  %v319_v39 = vmul.f32 %v489_v34, %v315_v32  ;;  %vm354_vm4 = vcmp.eq.s32.totalorder %v353_v25, 0 }
  0x5d   : > { %v320_v42 = vmul.f32 %v490_v37, %v316_v35  ;;  %v321_v45 = vsel %vm234_vm0, %v319_v39, 0.0 }
  0x5e   : > { %v322_v51 = vrot.slane %v321_v45, 4 }
  0x5f   : > { %v328_v48 = vsel %vm234_vm0, %v320_v42, 0.0 }
  0x60   : > { %v329_v54 = vrot.slane %v328_v48, 4  ;;  %v323_v57 = vadd.f32 %v322_v51, %v321_v45 }
  0x62   : > { %v330_v60 = vadd.f32 %v329_v54, %v328_v48  ;;  %v324_v62 = vrot.slane %v323_v57, 2 }
  0x64   : > { %v331_v63 = vrot.slane %v330_v60, 2  ;;  %v325_v1 = vadd.f32 %v324_v62, %v323_v57 }
  0x66   : > { %v332_v2 = vadd.f32 %v331_v63, %v330_v60  ;;  %v326_v3 = vrot.slane %v325_v1, 1 }
  0x68   : > { %v568_v36 = vpop.eup %567  ;;  %v333_v4 = vrot.slane %v332_v2, 1 }
  0x69   : > { %v270_v38 = vrot.slane %v568_v36, %v229_v5  ;;  %v327_v5 = vadd.f32 %v326_v3, %v325_v1 }
  0x6a   : > { %v334_v8 = vadd.f32 %v333_v4, %v332_v2 }
  0x6b   : > { %v271_v40 = vcombine.high %v270_v38, %v270_v38  ;;  %v274_v41 = vsel %vm234_vm0, %v270_v38, 0.0 }
  0x6c   : > { %v275_v43 = vrot.slane %v274_v41, 4 }
  0x6d   : > { %v281_v44 = vsel %vm234_vm0, %v271_v40, 0.0 }
  0x6e   : > { %v276_v46 = vadd.f32 %v275_v43, %v274_v41  ;;  %v282_v47 = vrot.slane %v281_v44, 4 }
  0x70   : > { %v277_v49 = vrot.slane %v276_v46, 2  ;;  %v283_v50 = vadd.f32 %v282_v47, %v281_v44 }
  0x72   : > { %v278_v52 = vadd.f32 %v277_v49, %v276_v46  ;;  %v284_v53 = vrot.slane %v283_v50, 2 }
  0x74   : > { %v279_v55 = vrot.slane %v278_v52, 1  ;;  %v285_v56 = vadd.f32 %v284_v53, %v283_v50 }
  0x76   : > { %v280_v58 = vadd.f32 %v279_v55, %v278_v52  ;;  %v286_v59 = vrot.slane %v285_v56, 1 }
  0x78   : > { %v287_v61 = vadd.f32 %v286_v59, %v285_v56  ;;  %569 = vlog2.f32 %v280_v58 }
  0x7a   : > { %571 = vlog2.f32 %v287_v61 }
  0x85   : > { %v570_v6 = vpop.eup %569 }
  0x86   : > { %v289_v7 = vmul.f32 0.6931472, %v570_v6 }
  0x87   : > { %v572_v9 = vpop.eup %571 }
  0x88   : > { %v291_v10 = vmul.f32 0.6931472, %v572_v9  ;;  %v335_v11 = vsub.f32 %v327_v5, %v289_v7 }
  0x8a   : > { %v336_v12 = vsub.f32 %v334_v8, %v291_v10  ;;  %v337_v13 = vsub.f32 0.0, %v335_v11 }
  0x8c   : > { %v338_v14 = vsub.f32 0.0, %v336_v12  ;;  %v340_v15 = vsel %vm339_vm3, %v337_v13, 0.0 }
  0x8e   : > { %v341_v16 = vsel %vm339_vm3, %v338_v14, 0.0 }
  0x8f   : > { %v342_v17 = vadd.f32 %v341_v16, %v340_v15 }
  0x91   : > { %343 = vadd.xlane.f32.xlu0 %v342_v17 }
 0x11a   : > { %v344_v18 = vpop.xlane.xlu0 %343 }
 0x11b   : > { %v345_v19 = vrot.slane %v344_v18, 4 }
 0x11d   : > { %v346_v20 = vadd.f32 %v345_v19, %v344_v18 }
 0x11f   : > { %v347_v21 = vrot.slane %v346_v20, 2 }
 0x121   : > { %v348_v22 = vadd.f32 %v347_v21, %v346_v20 }
 0x123   : > { %v349_v23 = vrot.slane %v348_v22, 1 }
 0x125   : > { %v350_v24 = vadd.f32 %v349_v23, %v348_v22 }
 0x127   : > { %496 = vpush %v350_v24 }
 0x158   : > { %s497_s28 = spop %496 }
 0x159   : > { %v355_v26 = vstv %s497_s28 }
 0x15a   : > { %v356_v27 = vsel %vm354_vm4, %v355_v26, 0.0 }
 0x15b   : > { %357 = vst [vmem:[%s218_s26] sm:$0x1] %v356_v27 }
 0x15c   : > { %642 = shalt.err (!%p639_p6)
}
 0x15d   : > { %s643_s15 = scalar_lea.hbm %s875_s7, 16  ;;  %s647_s19 = scalar_lea.hbm %s919_s2, 32 }
 0x15e   : > { %p644_p7 = scmp.ne.s32.totalorder %s875_s7, %s643_s15  ;;  %p648_p4 = scmp.lt.s32.totalorder %s875_s7, %s919_s2 }
 0x15f   : > { %p649_p10 = scmp.lt.s32.totalorder %s647_s19, %s643_s15 }
 0x160   : > { %p645_p1 = pnand %p644_p7, %p786_p9 }
 0x161   : > { %p650_p8 = por %p649_p10, %p648_p4 }
 0x162   : > { %p646_p2 = pneg %p645_p1 }
 0x164   : > { %p651_p0 = pnand %p650_p8, %p646_p2 }
 0x166   : > { %654 = shalt.err (!%p651_p0)
}
 0x167   : > { %502 = dma.vmem_to_hbm [thread:$0]  (%p786_p9), %s373_s27, 16, %s875_s7, %s359_s8  }
 0x168 PF: > { %s384_s20 = sand.u32 1, %s693_s9   ;;  %p926_p3 = scmp.ge.s32.totalorder %s713_s14, 2 }
 0x169   : > { %s385_s21 = scalar_lea.sflag [#allocation4], %s384_s20 }
 0x16a   : > { %p512_p13 = pnand %p926_p3, %p793_p11 }
 0x16c   : > { %p513_p5 = pneg %p512_p13 }
 0x16e   : > { %688 = dma.done.wait (%p513_p5), %s385_s21, 16  }
 0x16f   : > { %690 = vsyncadd (%p513_p5), %s385_s21, 4294967280  ;;  %s21_s14 = sadd.s32 1, %s713_s14   ;;  %s927_s9 = smov %s697_s10 }
 0x170   : > { %p18_p12 = scmp.ge.s32.totalorder %s21_s14, 4   ;;  %s928_s10 = smov %s701_s11 }
 0x171   : > { %s929_s11 = smov %s791_s23  ;;  %s930_s12 = smov %s709_s13 }
 0x172   : > { %s931_s13 = smov %s933_s17  ;;  %20 = sbr.rel (!%p18_p12) target bundleno = 8 (0x8), region = 86 }
 0x177   :  { %389 = vsyncpa [#allocation3], 1 }
 0x178   :  { %391 = vsyncpa [#allocation3 + $0x1], 1 }
 0x179   :  { %392 = vsyncpa [#allocation6], 1 }
 0x17a   :  { %394 = vsyncpa [#allocation6 + $0x1], 1 }
 0x17b   :  { %395 = vsyncpa [#allocation4], 1 }
 0x17c   :  { %397 = vsyncpa [#allocation4 + $0x1], 1 }

</bundles_post_ra>
